<compile_context>
chip_gen: v7x
topology: tpu7x:2x2x1
jax: 0.10.0
libtpu: 0.0.40
codegen_flags: <defaults>
</compile_context>

<pallas_src>
import functools

import jax
import jax.numpy as jnp
from jax import lax
from jax.experimental import pallas as pl
from jax.experimental.pallas import tpu as pltpu


def _gray_scott_kernel(a_ref, s_ref, da_ref, ds_ref, out1_ref, out2_ref,
                       acc1_ref, acc2_ref, *, DA_h2, DS_h2, mu_rho, rho, H, W):
    b = pl.program_id(1)

    @pl.when(b == 0)
    def _init():
        acc1_ref[...] = jnp.zeros_like(acc1_ref)
        acc2_ref[...] = jnp.zeros_like(acc2_ref)

    f32 = jnp.float32
    A = a_ref[...].astype(f32)      # (TB, H, W)
    S = s_ref[...].astype(f32)
    dA = da_ref[...].astype(f32)
    dS = ds_ref[...].astype(f32)

    # Hoisted boundary masks (computed once per grid step, shared by both
    # stencils): zero out the wrapped difference on row 0 / column 0.
    row_ids = lax.broadcasted_iota(jnp.int32, (1, H, W), 1)
    col_ids = lax.broadcasted_iota(jnp.int32, (1, H, W), 2)
    mask_row = (row_ids > 0).astype(f32)
    mask_col = (col_ids > 0).astype(f32)

    def lap_raw(u):
        # Replicate-BC 5-point Laplacian * h^2 via XLU rolls (positive shifts only):
        #   d_up[i] = u[i] - u[i-1]  (0 on row 0),   d_dn = -roll(d_up, H-1)
        #   => d_up + d_dn + d_lf + d_rt == 4u - up - dn - lf - rt with edge replication.
        d_up = mask_row * (u - pltpu.roll(u, shift=1, axis=1))
        d_lf = mask_col * (u - pltpu.roll(u, shift=1, axis=2))
        return ((d_up - pltpu.roll(d_up, shift=H - 1, axis=1))
                + (d_lf - pltpu.roll(d_lf, shift=W - 1, axis=2)))

    # Laplacian is linear: lap(A) + lap(dA) == lap(A + dA)  ->  2 stencils, not 4.
    AdA = A + dA
    SdS = S + dS
    lapA = lap_raw(AdA)             # == h^2 * lap(A + dA)
    lapS = lap_raw(SdS)

    # Shared reaction term: reac = S*A^2 + 2*S*A*dA + A^2*dS
    A2 = A * A
    SA = S * A
    reac = SA * (A + 2.0 * dA) + A2 * dS

    # r1 = DA*lap(A+dA) + (mu+rho)*(A+dA) - reac
    # r2 = DS*lap(S+dS) + reac + rho*(S + dS - 1)
    r1 = DA_h2 * lapA + mu_rho * AdA - reac
    r2 = DS_h2 * lapS + reac + rho * (SdS - 1.0)

    # Reduce over the batch-tile axis (leading dim -> pure VALU adds) into small
    # (H, W) accumulators; no cross-lane work in the hot loop.
    acc1_ref[...] += jnp.sum(r1 * r1, axis=0)
    acc2_ref[...] += jnp.sum(r2 * r2, axis=0)

    @pl.when(b == pl.num_programs(1) - 1)
    def _finalize():
        # One cross-lane/sublane reduction per core-split; sqrt + combine happen
        # in the wrapper so both TensorCores can produce independent partial sums.
        out1_ref[0] = jnp.sum(acc1_ref[...], keepdims=True)
        out2_ref[0] = jnp.sum(acc2_ref[...], keepdims=True)


def _vmem_capacity_bytes():
    try:
        cap = getattr(pltpu.get_tpu_info(), "vmem_capacity_bytes", None)
        if cap:
            return int(cap)
    except Exception:
        pass
    return 64 << 20   # conservative (v7x-sized) fallback


def _pick_tiling(B, H, W, batch_tile=None):
    """Per-chip batch tile, grid steps, core-split count and VMEM limit."""
    vmem_cap = _vmem_capacity_bytes()
    if vmem_cap >= (100 << 20):               # v5e / v6e: 128 MiB VMEM
        target_tile_bytes, vmem_limit = 8 << 20, 100 << 20
    else:                                     # v7x: 64 MiB VMEM per core
        target_tile_bytes, vmem_limit = 4 << 20, 48 << 20
    # Use the padded (sublane, lane) footprint, not logical bytes, so the
    # 4-input x 2-buffer pipeline stays inside the VMEM budget for any H/W.
    per_image = ((H + 7) // 8 * 8) * ((W + 127) // 128 * 128) * 4
    if batch_tile is None:
        tb = min(B, max(1, target_tile_bytes // per_image))
        nb = -(-B // tb)          # ceil
        tb = -(-B // nb)          # rebalance so padding is < one tile
    else:
        tb = int(batch_tile)
        nb = -(-B // tb)
    splits = 2 if (nb % 2 == 0 and nb >= 2) else 1
    return tb, nb, splits, vmem_limit


def pde_loss_gray_scott(A, S, delta_A, delta_S, *, DA=0.00025, DS=0.0005,
                        mu=0.065, rho=0.04, N=63, batch_tile=None):
    """Pallas implementation of PDEloss_GrayScott.forward (returns a scalar)."""
    assert A.ndim == 4 and A.shape[1] == 1, "expected NCHW with C == 1"
    B, _, H, W = A.shape
    h2 = (1.0 / (N - 1)) ** 2

    def prep(x):
        x = x.reshape(B, H, W)
        if x.dtype not in (jnp.float32, jnp.bfloat16):
            x = x.astype(jnp.float32)   # bf16 inputs stream as-is, upcast in-kernel
        return x

    a, s, da, ds = (prep(x) for x in (A, S, delta_A, delta_S))

    TB, nb, splits, vmem_limit = _pick_tiling(B, H, W, batch_tile)
    B_pad = TB * nb
    if B_pad != B:
        # Pad with the Gray-Scott fixed point (A=0, S=1, dA=dS=0): padded images
        # contribute exactly zero residual, so no in-kernel masking is needed.
        pad = B_pad - B
        a = jnp.concatenate([a, jnp.zeros((pad, H, W), a.dtype)], axis=0)
        s = jnp.concatenate([s, jnp.ones((pad, H, W), s.dtype)], axis=0)
        da = jnp.concatenate([da, jnp.zeros((pad, H, W), da.dtype)], axis=0)
        ds = jnp.concatenate([ds, jnp.zeros((pad, H, W), ds.dtype)], axis=0)

    steps = nb // splits
    kernel = functools.partial(
        _gray_scott_kernel, DA_h2=DA / h2, DS_h2=DS / h2,
        mu_rho=mu + rho, rho=rho, H=H, W=W)

    block = pl.BlockSpec((TB, H, W), lambda c, b: (c * steps + b, 0, 0))
    out_block = pl.BlockSpec((1, 1, 1), lambda c, b: (c, 0, 0))

    out1, out2 = pl.pallas_call(
        kernel,
        out_shape=(jax.ShapeDtypeStruct((splits, 1, 1), jnp.float32),
                   jax.ShapeDtypeStruct((splits, 1, 1), jnp.float32)),
        grid_spec=pltpu.PrefetchScalarGridSpec(
            num_scalar_prefetch=0,
            grid=(splits, steps),
            in_specs=[block, block, block, block],
            out_specs=[out_block, out_block],
            scratch_shapes=[pltpu.VMEM((H, W), jnp.float32),
                            pltpu.VMEM((H, W), jnp.float32)],
        ),
        compiler_params=pltpu.CompilerParams(
            dimension_semantics=("parallel", "arbitrary"),  # core split, batch accum
            vmem_limit_bytes=vmem_limit,
        ),
    )(a, s, da, ds)

    return jnp.sqrt(jnp.sum(out1)) + jnp.sqrt(jnp.sum(out2))


def _reference_loss(A, S, dA, dS, DA, DS, mu, rho, N):
    """Pure-JAX reference mirroring the PyTorch forward exactly (4 Laplacians)."""
    h = 1.0 / (N - 1)

    def lap(u):
        p = jnp.pad(u, ((0, 0), (0, 0), (1, 1), (1, 1)), mode="edge")
        return (4.0 * p[:, :, 1:-1, 1:-1]
                - p[:, :, :-2, 1:-1] - p[:, :, 2:, 1:-1]
                - p[:, :, 1:-1, :-2] - p[:, :, 1:-1, 2:]) / h ** 2

    lap_A, lap_S, lap_dA, lap_dS = lap(A), lap(S), lap(dA), lap(dS)
    F_A = DA * lap_A - S * A ** 2 + (mu + rho) * A
    F_S = DS * lap_S + S * A ** 2 - rho * (1 - S)
    J_AA_dA = DA * lap_dA - 2 * dA * S * A + (mu + rho) * dA
    J_SS_dS = DS * lap_dS + (A ** 2 + rho) * dS
    J_AS_dS = -(A ** 2) * dS
    J_SA_dA = 2 * S * A * dA
    return (jnp.linalg.norm((J_AA_dA + J_AS_dS + F_A).ravel())
            + jnp.linalg.norm((J_SA_dA + J_SS_dS + F_S).ravel()))


if __name__ == "__main__":
    key = jax.random.PRNGKey(0)
    kA, kS, kdA, kdS = jax.random.split(key, 4)
    B, C, H, W = 2, 1, 16, 128  # small NCHW test shapes (C must be 1)

    A = jax.random.uniform(kA, (B, C, H, W), jnp.float32)
    S = jax.random.uniform(kS, (B, C, H, W), jnp.float32)
    delta_A = 0.01 * jax.random.normal(kdA, (B, C, H, W), jnp.float32)
    delta_S = 0.01 * jax.random.normal(kdS, (B, C, H, W), jnp.float32)

    ref = _reference_loss(A, S, delta_A, delta_S,
                          DA=0.00025, DS=0.0005, mu=0.065, rho=0.04, N=63)

    # Default tiling: whole batch in one grid step (single split).
    loss = jax.block_until_ready(pde_loss_gray_scott(A, S, delta_A, delta_S))
    assert jnp.allclose(loss, ref, rtol=1e-3, atol=1e-3), (loss, ref)

    # Multi-step accumulation + 2-way core-split path (one image per grid step).
    loss_tiled = jax.block_until_ready(
        pde_loss_gray_scott(A, S, delta_A, delta_S, batch_tile=1))
    assert jnp.allclose(loss_tiled, ref, rtol=1e-3, atol=1e-3), (loss_tiled, ref)

    # Odd batch -> padded with the zero-residual fixed point (A=0, S=1).
    B3 = 3
    A3 = jax.random.uniform(kA, (B3, C, H, W), jnp.float32)
    S3 = jax.random.uniform(kS, (B3, C, H, W), jnp.float32)
    dA3 = 0.01 * jax.random.normal(kdA, (B3, C, H, W), jnp.float32)
    dS3 = 0.01 * jax.random.normal(kdS, (B3, C, H, W), jnp.float32)
    ref3 = _reference_loss(A3, S3, dA3, dS3,
                           DA=0.00025, DS=0.0005, mu=0.065, rho=0.04, N=63)
    loss3 = jax.block_until_ready(
        pde_loss_gray_scott(A3, S3, dA3, dS3, batch_tile=2))
    assert jnp.allclose(loss3, ref3, rtol=1e-3, atol=1e-3), (loss3, ref3)

    print("KERNEL_OK")
</pallas_src>

<mosaic_0001>
module attributes {stable_mosaic.version = 11 : i64} {
  func.func @_gray_scott_kernel(%arg0: i32, %arg1: i32, %arg2: memref<2x16x128xf32, #tpu.memory_space<vmem>>, %arg3: memref<2x16x128xf32, #tpu.memory_space<vmem>>, %arg4: memref<2x16x128xf32, #tpu.memory_space<vmem>>, %arg5: memref<2x16x128xf32, #tpu.memory_space<vmem>>, %arg6: memref<1x1x1xf32, #tpu.memory_space<vmem>>, %arg7: memref<1x1x1xf32, #tpu.memory_space<vmem>>, %arg8: memref<16x128xf32, #tpu.memory_space<vmem>>, %arg9: memref<16x128xf32, #tpu.memory_space<vmem>>) attributes {dimension_semantics = [#tpu.dimension_semantics<parallel>, #tpu.dimension_semantics<arbitrary>], iteration_bounds = array<i64: 1, 1>, scalar_prefetch = 0 : i64, scratch_operands = 2 : i64, tpu.core_type = #tpu.core_type<tc>, window_params = [{transform_indices = @transform_0, window_bounds = array<i64: 2, 16, 128>}, {transform_indices = @transform_1, window_bounds = array<i64: 2, 16, 128>}, {transform_indices = @transform_2, window_bounds = array<i64: 2, 16, 128>}, {transform_indices = @transform_3, window_bounds = array<i64: 2, 16, 128>}, {transform_indices = @transform_4, window_bounds = array<i64: 1, 1, 1>}, {transform_indices = @transform_5, window_bounds = array<i64: 1, 1, 1>}]} {
    %c0_i32 = arith.constant 0 : i32
    %0 = arith.cmpi eq, %arg1, %c0_i32 : i32
    %1 = arith.extui %0 : i1 to i32
    %c0_i32_0 = arith.constant 0 : i32
    %2 = arith.cmpi ne, %1, %c0_i32_0 : i32
    scf.if %2 {
      %cst_36 = arith.constant 0.000000e+00 : f32
      %80 = vector.broadcast %cst_36 : f32 to vector<16x128xf32>
      %c0_37 = arith.constant 0 : index
      %c0_38 = arith.constant 0 : index
      %81 = vector.load %arg8[%c0_37, %c0_38] : memref<16x128xf32, #tpu.memory_space<vmem>>, vector<16x128xf32>
      tpu.vector_store %arg8[%c0_37, %c0_38], %80 {strides = array<i32>} : memref<16x128xf32, #tpu.memory_space<vmem>>, vector<16x128xf32>,
      %cst_39 = arith.constant 0.000000e+00 : f32
      %82 = vector.broadcast %cst_39 : f32 to vector<16x128xf32>
      %c0_40 = arith.constant 0 : index
      %c0_41 = arith.constant 0 : index
      %83 = vector.load %arg9[%c0_40, %c0_41] : memref<16x128xf32, #tpu.memory_space<vmem>>, vector<16x128xf32>
      tpu.vector_store %arg9[%c0_40, %c0_41], %82 {strides = array<i32>} : memref<16x128xf32, #tpu.memory_space<vmem>>, vector<16x128xf32>,
    } else {
    }
    %c0 = arith.constant 0 : index
    %c0_1 = arith.constant 0 : index
    %c0_2 = arith.constant 0 : index
    %3 = vector.load %arg2[%c0, %c0_1, %c0_2] : memref<2x16x128xf32, #tpu.memory_space<vmem>>, vector<2x16x128xf32>
    %c0_3 = arith.constant 0 : index
    %c0_4 = arith.constant 0 : index
    %c0_5 = arith.constant 0 : index
    %4 = vector.load %arg3[%c0_3, %c0_4, %c0_5] : memref<2x16x128xf32, #tpu.memory_space<vmem>>, vector<2x16x128xf32>
    %c0_6 = arith.constant 0 : index
    %c0_7 = arith.constant 0 : index
    %c0_8 = arith.constant 0 : index
    %5 = vector.load %arg4[%c0_6, %c0_7, %c0_8] : memref<2x16x128xf32, #tpu.memory_space<vmem>>, vector<2x16x128xf32>
    %c0_9 = arith.constant 0 : index
    %c0_10 = arith.constant 0 : index
    %c0_11 = arith.constant 0 : index
    %6 = vector.load %arg5[%c0_9, %c0_10, %c0_11] : memref<2x16x128xf32, #tpu.memory_space<vmem>>, vector<2x16x128xf32>
    %7 = tpu.iota {dimensions = array<i32: 1>} : vector<1x16x128xi32>
    %8 = tpu.iota {dimensions = array<i32: 2>} : vector<1x16x128xi32>
    %c0_i32_12 = arith.constant 0 : i32
    %9 = vector.broadcast %c0_i32_12 : i32 to vector<1x16x128xi32>
    %10 = arith.cmpi sgt, %7, %9 : vector<1x16x128xi32>
    %11 = arith.extui %10 : vector<1x16x128xi1> to vector<1x16x128xi32>
    %12 = arith.sitofp %11 : vector<1x16x128xi32> to vector<1x16x128xf32>
    %c0_i32_13 = arith.constant 0 : i32
    %13 = vector.broadcast %c0_i32_13 : i32 to vector<1x16x128xi32>
    %14 = arith.cmpi sgt, %8, %13 : vector<1x16x128xi32>
    %15 = arith.extui %14 : vector<1x16x128xi1> to vector<1x16x128xi32>
    %16 = arith.sitofp %15 : vector<1x16x128xi32> to vector<1x16x128xf32>
    %17 = arith.addf %3, %5 : vector<2x16x128xf32>
    %18 = arith.addf %4, %6 : vector<2x16x128xf32>
    %c1_i32 = arith.constant 1 : i32
    %19 = tpu.dynamic_rotate %17 by %c1_i32 dim 1 : vector<2x16x128xf32>, i32 -> vector<2x16x128xf32>
    %20 = arith.subf %17, %19 : vector<2x16x128xf32>
    %21 = vector.broadcast %12 : vector<1x16x128xf32> to vector<2x16x128xf32>
    %22 = arith.mulf %21, %20 : vector<2x16x128xf32>
    %c1_i32_14 = arith.constant 1 : i32
    %23 = tpu.dynamic_rotate %17 by %c1_i32_14 dim 2 : vector<2x16x128xf32>, i32 -> vector<2x16x128xf32>
    %24 = arith.subf %17, %23 : vector<2x16x128xf32>
    %25 = vector.broadcast %16 : vector<1x16x128xf32> to vector<2x16x128xf32>
    %26 = arith.mulf %25, %24 : vector<2x16x128xf32>
    %c15_i32 = arith.constant 15 : i32
    %27 = tpu.dynamic_rotate %22 by %c15_i32 dim 1 : vector<2x16x128xf32>, i32 -> vector<2x16x128xf32>
    %28 = arith.subf %22, %27 : vector<2x16x128xf32>
    %c127_i32 = arith.constant 127 : i32
    %29 = tpu.dynamic_rotate %26 by %c127_i32 dim 2 : vector<2x16x128xf32>, i32 -> vector<2x16x128xf32>
    %30 = arith.subf %26, %29 : vector<2x16x128xf32>
    %31 = arith.addf %28, %30 : vector<2x16x128xf32>
    %c1_i32_15 = arith.constant 1 : i32
    %32 = tpu.dynamic_rotate %18 by %c1_i32_15 dim 1 : vector<2x16x128xf32>, i32 -> vector<2x16x128xf32>
    %33 = arith.subf %18, %32 : vector<2x16x128xf32>
    %34 = vector.broadcast %12 : vector<1x16x128xf32> to vector<2x16x128xf32>
    %35 = arith.mulf %34, %33 : vector<2x16x128xf32>
    %c1_i32_16 = arith.constant 1 : i32
    %36 = tpu.dynamic_rotate %18 by %c1_i32_16 dim 2 : vector<2x16x128xf32>, i32 -> vector<2x16x128xf32>
    %37 = arith.subf %18, %36 : vector<2x16x128xf32>
    %38 = vector.broadcast %16 : vector<1x16x128xf32> to vector<2x16x128xf32>
    %39 = arith.mulf %38, %37 : vector<2x16x128xf32>
    %c15_i32_17 = arith.constant 15 : i32
    %40 = tpu.dynamic_rotate %35 by %c15_i32_17 dim 1 : vector<2x16x128xf32>, i32 -> vector<2x16x128xf32>
    %41 = arith.subf %35, %40 : vector<2x16x128xf32>
    %c127_i32_18 = arith.constant 127 : i32
    %42 = tpu.dynamic_rotate %39 by %c127_i32_18 dim 2 : vector<2x16x128xf32>, i32 -> vector<2x16x128xf32>
    %43 = arith.subf %39, %42 : vector<2x16x128xf32>
    %44 = arith.addf %41, %43 : vector<2x16x128xf32>
    %45 = arith.mulf %3, %3 : vector<2x16x128xf32>
    %46 = arith.mulf %4, %3 : vector<2x16x128xf32>
    %cst = arith.constant 2.000000e+00 : f32
    %47 = vector.broadcast %cst : f32 to vector<2x16x128xf32>
    %48 = arith.mulf %47, %5 : vector<2x16x128xf32>
    %49 = arith.addf %3, %48 : vector<2x16x128xf32>
    %50 = arith.mulf %46, %49 : vector<2x16x128xf32>
    %51 = arith.mulf %45, %6 : vector<2x16x128xf32>
    %52 = arith.addf %50, %51 : vector<2x16x128xf32>
    %cst_19 = arith.constant 9.610000e-01 : f32
    %53 = vector.broadcast %cst_19 : f32 to vector<2x16x128xf32>
    %54 = arith.mulf %53, %31 : vector<2x16x128xf32>
    %cst_20 = arith.constant 1.050000e-01 : f32
    %55 = vector.broadcast %cst_20 : f32 to vector<2x16x128xf32>
    %56 = arith.mulf %55, %17 : vector<2x16x128xf32>
    %57 = arith.addf %54, %56 : vector<2x16x128xf32>
    %58 = arith.subf %57, %52 : vector<2x16x128xf32>
    %cst_21 = arith.constant 1.922000e+00 : f32
    %59 = vector.broadcast %cst_21 : f32 to vector<2x16x128xf32>
    %60 = arith.mulf %59, %44 : vector<2x16x128xf32>
    %61 = arith.addf %60, %52 : vector<2x16x128xf32>
    %cst_22 = arith.constant 1.000000e+00 : f32
    %62 = vector.broadcast %cst_22 : f32 to vector<2x16x128xf32>
    %63 = arith.subf %18, %62 : vector<2x16x128xf32>
    %cst_23 = arith.constant 4.000000e-02 : f32
    %64 = vector.broadcast %cst_23 : f32 to vector<2x16x128xf32>
    %65 = arith.mulf %64, %63 : vector<2x16x128xf32>
    %66 = arith.addf %61, %65 : vector<2x16x128xf32>
    %c0_24 = arith.constant 0 : index
    %c0_25 = arith.constant 0 : index
    %67 = vector.load %arg8[%c0_24, %c0_25] : memref<16x128xf32, #tpu.memory_space<vmem>>, vector<16x128xf32>
    %68 = arith.mulf %58, %58 : vector<2x16x128xf32>
    %cst_26 = arith.constant dense<0.000000e+00> : vector<16x128xf32>
    %69 = vector.multi_reduction <add>, %68, %cst_26 [0] : vector<2x16x128xf32> to vector<16x128xf32>
    %70 = arith.addf %67, %69 : vector<16x128xf32>
    %c0_27 = arith.constant 0 : index
    %c0_28 = arith.constant 0 : index
    %71 = vector.load %arg8[%c0_27, %c0_28] : memref<16x128xf32, #tpu.memory_space<vmem>>, vector<16x128xf32>
    tpu.vector_store %arg8[%c0_27, %c0_28], %70 {strides = array<i32>} : memref<16x128xf32, #tpu.memory_space<vmem>>, vector<16x128xf32>,
    %c0_29 = arith.constant 0 : index
    %c0_30 = arith.constant 0 : index
    %72 = vector.load %arg9[%c0_29, %c0_30] : memref<16x128xf32, #tpu.memory_space<vmem>>, vector<16x128xf32>
    %73 = arith.mulf %66, %66 : vector<2x16x128xf32>
    %cst_31 = arith.constant dense<0.000000e+00> : vector<16x128xf32>
    %74 = vector.multi_reduction <add>, %73, %cst_31 [0] : vector<2x16x128xf32> to vector<16x128xf32>
    %75 = arith.addf %72, %74 : vector<16x128xf32>
    %c0_32 = arith.constant 0 : index
    %c0_33 = arith.constant 0 : index
    %76 = vector.load %arg9[%c0_32, %c0_33] : memref<16x128xf32, #tpu.memory_space<vmem>>, vector<16x128xf32>
    tpu.vector_store %arg9[%c0_32, %c0_33], %75 {strides = array<i32>} : memref<16x128xf32, #tpu.memory_space<vmem>>, vector<16x128xf32>,
    %c0_i32_34 = arith.constant 0 : i32
    %77 = arith.cmpi eq, %arg1, %c0_i32_34 : i32
    %78 = arith.extui %77 : i1 to i32
    %c0_i32_35 = arith.constant 0 : i32
    %79 = arith.cmpi ne, %78, %c0_i32_35 : i32
    scf.if %79 {
      %c0_36 = arith.constant 0 : index
      %c0_37 = arith.constant 0 : index
      %80 = vector.load %arg8[%c0_36, %c0_37] : memref<16x128xf32, #tpu.memory_space<vmem>>, vector<16x128xf32>
      %81 = vector.shape_cast %80 : vector<16x128xf32> to vector<1x16x128xf32>
      %cst_38 = arith.constant dense<0.000000e+00> : vector<1xf32>
      %82 = vector.multi_reduction <add>, %81, %cst_38 [1, 2] : vector<1x16x128xf32> to vector<1xf32>
      %83 = vector.shape_cast %82 : vector<1xf32> to vector<1x1x1xf32>
      %84 = vector.extract %83[0, 0, 0] : f32 from vector<1x1x1xf32>
      %85 = vector.broadcast %84 : f32 to vector<1x1xf32>
      %c0_39 = arith.constant 0 : index
      %c0_40 = arith.constant 0 : index
      %c0_41 = arith.constant 0 : index
      %86 = vector.load %arg6[%c0_39, %c0_40, %c0_41] : memref<1x1x1xf32, #tpu.memory_space<vmem>>, vector<1x1x1xf32>
      %87 = vector.shape_cast %86 : vector<1x1x1xf32> to vector<1x1xf32>
      %88 = vector.shape_cast %85 : vector<1x1xf32> to vector<1x1x1xf32>
      tpu.vector_store %arg6[%c0_39, %c0_40, %c0_41], %88 {strides = array<i32>} : memref<1x1x1xf32, #tpu.memory_space<vmem>>, vector<1x1x1xf32>,
      %c0_42 = arith.constant 0 : index
      %c0_43 = arith.constant 0 : index
      %89 = vector.load %arg9[%c0_42, %c0_43] : memref<16x128xf32, #tpu.memory_space<vmem>>, vector<16x128xf32>
      %90 = vector.shape_cast %89 : vector<16x128xf32> to vector<1x16x128xf32>
      %cst_44 = arith.constant dense<0.000000e+00> : vector<1xf32>
      %91 = vector.multi_reduction <add>, %90, %cst_44 [1, 2] : vector<1x16x128xf32> to vector<1xf32>
      %92 = vector.shape_cast %91 : vector<1xf32> to vector<1x1x1xf32>
      %93 = vector.extract %92[0, 0, 0] : f32 from vector<1x1x1xf32>
      %94 = vector.broadcast %93 : f32 to vector<1x1xf32>
      %c0_45 = arith.constant 0 : index
      %c0_46 = arith.constant 0 : index
      %c0_47 = arith.constant 0 : index
      %95 = vector.load %arg7[%c0_45, %c0_46, %c0_47] : memref<1x1x1xf32, #tpu.memory_space<vmem>>, vector<1x1x1xf32>
      %96 = vector.shape_cast %95 : vector<1x1x1xf32> to vector<1x1xf32>
      %97 = vector.shape_cast %94 : vector<1x1xf32> to vector<1x1x1xf32>
      tpu.vector_store %arg7[%c0_45, %c0_46, %c0_47], %97 {strides = array<i32>} : memref<1x1x1xf32, #tpu.memory_space<vmem>>, vector<1x1x1xf32>,
    } else {
    }
    return
  }
  func.func @transform_0(%arg0: i32, %arg1: i32) -> (i32, i32, i32) {
    %c1_i32 = arith.constant 1 : i32
    %0 = arith.muli %arg0, %c1_i32 : i32
    %1 = arith.addi %0, %arg1 : i32
    %c0_i32 = arith.constant 0 : i32
    %c0_i32_0 = arith.constant 0 : i32
    %c0_i32_1 = arith.constant 0 : i32
    return %1, %c0_i32, %c0_i32_0 : i32, i32, i32
  }
  func.func @transform_1(%arg0: i32, %arg1: i32) -> (i32, i32, i32) {
    %c1_i32 = arith.constant 1 : i32
    %0 = arith.muli %arg0, %c1_i32 : i32
    %1 = arith.addi %0, %arg1 : i32
    %c0_i32 = arith.constant 0 : i32
    %c0_i32_0 = arith.constant 0 : i32
    %c0_i32_1 = arith.constant 0 : i32
    return %1, %c0_i32, %c0_i32_0 : i32, i32, i32
  }
  func.func @transform_2(%arg0: i32, %arg1: i32) -> (i32, i32, i32) {
    %c1_i32 = arith.constant 1 : i32
    %0 = arith.muli %arg0, %c1_i32 : i32
    %1 = arith.addi %0, %arg1 : i32
    %c0_i32 = arith.constant 0 : i32
    %c0_i32_0 = arith.constant 0 : i32
    %c0_i32_1 = arith.constant 0 : i32
    return %1, %c0_i32, %c0_i32_0 : i32, i32, i32
  }
  func.func @transform_3(%arg0: i32, %arg1: i32) -> (i32, i32, i32) {
    %c1_i32 = arith.constant 1 : i32
    %0 = arith.muli %arg0, %c1_i32 : i32
    %1 = arith.addi %0, %arg1 : i32
    %c0_i32 = arith.constant 0 : i32
    %c0_i32_0 = arith.constant 0 : i32
    %c0_i32_1 = arith.constant 0 : i32
    return %1, %c0_i32, %c0_i32_0 : i32, i32, i32
  }
  func.func @transform_4(%arg0: i32, %arg1: i32) -> (i32, i32, i32) {
    %c0_i32 = arith.constant 0 : i32
    %c0_i32_0 = arith.constant 0 : i32
    %c0_i32_1 = arith.constant 0 : i32
    return %arg0, %c0_i32, %c0_i32_0 : i32, i32, i32
  }
  func.func @transform_5(%arg0: i32, %arg1: i32) -> (i32, i32, i32) {
    %c0_i32 = arith.constant 0 : i32
    %c0_i32_0 = arith.constant 0 : i32
    %c0_i32_1 = arith.constant 0 : i32
    return %arg0, %c0_i32, %c0_i32_0 : i32, i32, i32
  }
}

</mosaic_0001>

<bundles_post_ra>
// kernel: tpu_custom_call.1
= control target key start
LH: loop header
LB: loop body
LE: loop exit
PB: predicated region body
PF: predicated region fallthrough
CT: control target
= control target key end

     0   :  { %11 = vsyncpa [#allocation5], 0  ;;  %s1014_s0 = inlined_call_operand.hbm [shape: f32[2,16,128], index: 0, kind: input, shape index: {}]   ;;  %s1015_s1 = inlined_call_operand.hbm [shape: f32[2,16,128], index: 1, kind: input, shape index: {}]   ;;  %s1016_s2 = inlined_call_operand.hbm [shape: f32[2,16,128], index: 2, kind: input, shape index: {}]   ;;  %s1017_s3 = inlined_call_operand.hbm [shape: f32[2,16,128], index: 3, kind: input, shape index: {}]   ;;  %s1018_s4 = inlined_call_operand.hbm [shape: f32[1,1,1], index: 4, kind: output, shape index: {0}]   ;;  %s1019_s5 = inlined_call_operand.hbm [shape: f32[1,1,1], index: 5, kind: output, shape index: {1}]  }
   0x1   :  { %12 = vsyncpa [#allocation8], 0 }
   0x2   :  { %13 = vsyncpa [#allocation11], 0 }
   0x3   :  { %14 = vsyncpa [#allocation6], 0 }
   0x4   :  { %15 = vsyncpa [#allocation14], 0  ;;  %s586_s18 = smov [#allocation7]   ;;  %s587_s20 = smov [#allocation4]  }
   0x5   :  { %s43_s19 = sshll.u32 %s586_s18, 4  ;;  %s26_s21 = sshll.u32 %s587_s20, 4  ;;  %s44_s19 = int_to_ptr.vmem [resolvable:$true] %s43_s19  ;;  %s627_s21 = int_to_ptr.vmem [resolvable:$true] %s26_s21 }
   0x6   :  { %s444_s24 = scalar_lea.hbm %s1015_s1, 512 }
   0x7   :  { %p445_p0 = scmp.ne.s32.totalorder %s1015_s1, %s444_s24  ;;  %p448_p1 = scmp.lt.u32.totalorder %s444_s24, %s1015_s1 }
   0x9   :  { %p450_p2 = pnand %p448_p1, %p445_p0 }
   0xb   :  { %453 = shalt.err (!%p450_p2)
}
   0xc   :  { %s454_s29 = scalar_lea.vmem %s44_s19, 512  ;;  %p459_p4 = scmp.lt.s32.totalorder %s44_s19, %s44_s19 }
   0xd   :  { %p455_p3 = scmp.ne.s32.totalorder %s44_s19, %s454_s29  ;;  %p460_p5 = scmp.lt.s32.totalorder %s454_s29, %s454_s29 }
   0xf   :  { %p461_p6 = por %p460_p5, %p459_p4 }
  0x11   :  { %p462_p7 = pnand %p461_p6, %p455_p3 }
  0x13   :  { %465 = shalt.err (!%p462_p7)
}
  0x14   :  { %s588_s30 = smov 128   ;;  %s589_s6 = smov 8  }
  0x15   :  { %49 = dma.hbm_to_vmem [thread:$0]  %s1015_s1, 512, %s44_s19, [#allocation8], %s588_s30, %s588_s30, %s589_s6  }
  0x16   :  { %s466_s11 = scalar_lea.hbm %s1014_s0, 512 }
  0x17   :  { %p467_p8 = scmp.ne.s32.totalorder %s1014_s0, %s466_s11  ;;  %p470_p9 = scmp.lt.u32.totalorder %s466_s11, %s1014_s0 }
  0x19   :  { %p472_p10 = pnand %p470_p9, %p467_p8 }
  0x1b   :  { %475 = shalt.err (!%p472_p10)
}
  0x1c   :  { %s476_s16 = scalar_lea.vmem %s627_s21, 512  ;;  %p481_p12 = scmp.lt.s32.totalorder %s627_s21, %s627_s21 }
  0x1d   :  { %p477_p11 = scmp.ne.s32.totalorder %s627_s21, %s476_s16  ;;  %p482_p13 = scmp.lt.s32.totalorder %s476_s16, %s476_s16 }
  0x1f   :  { %p483_p0 = por %p482_p13, %p481_p12 }
  0x21   :  { %p484_p1 = pnand %p483_p0, %p477_p11 }
  0x23   :  { %487 = shalt.err (!%p484_p1)
}
  0x24   :  { %32 = dma.hbm_to_vmem [thread:$0]  %s1014_s0, 512, %s627_s21, [#allocation5], %s588_s30, %s588_s30, %s589_s6  }
  0x25   :  { %s590_s18 = smov [#allocation9]   ;;  %s591_s20 = smov [#allocation10]  }
  0x26   :  { %s60_s19 = sshll.u32 %s590_s18, 4  ;;  %s77_s22 = sshll.u32 %s591_s20, 4  ;;  %s61_s19 = int_to_ptr.vmem [resolvable:$true] %s60_s19  ;;  %s664_s22 = int_to_ptr.vmem [resolvable:$true] %s77_s22 }
  0x27   :  { %s488_s25 = scalar_lea.hbm %s1016_s2, 512 }
  0x28   :  { %p489_p2 = scmp.ne.s32.totalorder %s1016_s2, %s488_s25  ;;  %p492_p3 = scmp.lt.u32.totalorder %s488_s25, %s1016_s2 }
  0x2a   :  { %p494_p4 = pnand %p492_p3, %p489_p2 }
  0x2c   :  { %497 = shalt.err (!%p494_p4)
}
  0x2d   :  { %s498_s0 = scalar_lea.vmem %s61_s19, 512  ;;  %p503_p6 = scmp.lt.s32.totalorder %s61_s19, %s61_s19 }
  0x2e   :  { %p499_p5 = scmp.ne.s32.totalorder %s61_s19, %s498_s0  ;;  %p504_p7 = scmp.lt.s32.totalorder %s498_s0, %s498_s0 }
  0x30   :  { %p505_p8 = por %p504_p7, %p503_p6 }
  0x32   :  { %p506_p9 = pnand %p505_p8, %p499_p5 }
  0x34   :  { %509 = shalt.err (!%p506_p9)
}
  0x35   :  { %66 = dma.hbm_to_vmem [thread:$0]  %s1016_s2, 512, %s61_s19, [#allocation8], %s588_s30, %s588_s30, %s589_s6  }
  0x36   :  { %s510_s10 = scalar_lea.hbm %s1017_s3, 512 }
  0x37   :  { %p511_p10 = scmp.ne.s32.totalorder %s1017_s3, %s510_s10  ;;  %p514_p11 = scmp.lt.u32.totalorder %s510_s10, %s1017_s3 }
  0x39   :  { %p516_p12 = pnand %p514_p11, %p511_p10 }
  0x3b   :  { %519 = shalt.err (!%p516_p12)
}
  0x3c   :  { %s520_s15 = scalar_lea.vmem %s664_s22, 512  ;;  %p525_p0 = scmp.lt.s32.totalorder %s664_s22, %s664_s22 }
  0x3d   :  { %p521_p13 = scmp.ne.s32.totalorder %s664_s22, %s520_s15  ;;  %p526_p1 = scmp.lt.s32.totalorder %s520_s15, %s520_s15 }
  0x3f   :  { %p527_p2 = por %p526_p1, %p525_p0 }
  0x41   :  { %p528_p3 = pnand %p527_p2, %p521_p13 }
  0x43   :  { %531 = shalt.err (!%p528_p3)
}
  0x44   :  { %83 = dma.hbm_to_vmem [thread:$0]  %s1017_s3, 512, %s664_s22, [#allocation11], %s588_s30, %s588_s30, %s589_s6  }
  0x45   :  { %576 = dma.done.wait [#allocation5], 512  }
  0x46   :  { %577 = vsyncadd [#allocation5], 4294966784 }
  0x47   :  { %578 = dma.done.wait [#allocation8], 1024  }
  0x48   :  { %579 = vsyncadd [#allocation8], 4294966272 }
  0x49   :  { %580 = dma.done.wait [#allocation11], 512  }
  0x4a   :  { %581 = vsyncadd [#allocation11], 4294966784  ;;  %v701_v0 = vld [vmem:[#allocation4] sm:$0xff]  ;;  %v705_v2 = vld [vmem:[#allocation4 + $0x10] sm:$0xff]  ;;  %s592_s3 = smov 1   ;;  %v128_v20 = vlaneseq  ;;  %v593_v26 = vmov 0.0  }
  0x4b   :  { %v703_v1 = vld [vmem:[#allocation9] sm:$0xff]  ;;  %v711_v4 = vld [vmem:[#allocation9 + $0x10] sm:$0xff]  ;;  %v713_v5 = vld [vmem:[#allocation4 + $0x8] sm:$0xff]  ;;  %s594_s30 = smov 127   ;;  %s595_s6 = smov [#allocation12]   ;;  %vm376_vm4 = vcmask 0  }
  0x4c   :  { %v709_v3 = vadd.f32 %v703_v1, %v701_v0  ;;  %v715_v6 = vld [vmem:[#allocation9 + $0x8] sm:$0xff]  ;;  %v719_v7 = vadd.f32 %v711_v4, %v705_v2  ;;  %v721_v8 = vld [vmem:[#allocation4 + $0x18] sm:$0xff]  ;;  %v735_v12 = vld [vmem:[#allocation7] sm:$0xff]  ;;  %v761_v23 = vshrl.u32 %v128_v20, 7  ;;  %v132_v49 = vand.u32 127, %v128_v20  ;;  %s398_s1 = sshll.u32 %s595_s6, 4  ;;  %s399_s1 = int_to_ptr.vmem [resolvable:$true] %s398_s1 }
  0x4d   :  { %v723_v9 = vld [vmem:[#allocation9 + $0x18] sm:$0xff]  ;;  %v728_v10 = vadd.f32 %v715_v6, %v713_v5  ;;  %v737_v13 = vld [vmem:[#allocation10] sm:$0xff]  ;;  %v739_v14 = vld [vmem:[#allocation7 + $0x8] sm:$0xff]  ;;  %s532_s18 = scalar_lea.vmem %s399_s1, 16  ;;  %s536_s19 = scalar_lea.vmem %s399_s1, 32 }
  0x4e   :  { %167 = vrot.lane.b32.xlu0 %v709_v3, %s592_s3  ;;  %171 = vrot.lane.b32.xlu1 %v719_v7, %s592_s3  ;;  %v733_v11 = vadd.f32 %v723_v9, %v721_v8  ;;  %v741_v15 = vld [vmem:[#allocation10 + $0x8] sm:$0xff]  ;;  %v746_v16 = vadd.f32 %v737_v13, %v735_v12  ;;  %v753_v18 = vld [vmem:[#allocation7 + $0x10] sm:$0xff]  ;;  %v757_v21 = vld [vmem:[#allocation7 + $0x18] sm:$0xff]  ;;  %vm133_vm0 = vcmp.gt.s32.totalorder %v761_v23, 0  ;;  %vm154_vm1 = vcmp.lt.s32.totalorder %v761_v23, 1  ;;  %p533_p4 = scmp.ne.s32.totalorder %s399_s1, %s532_s18  ;;  %p537_p5 = scmp.lt.s32.totalorder %s399_s1, %s399_s1 }
  0x4f   :  { %v751_v17 = vadd.f32 %v741_v15, %v739_v14  ;;  %v755_v19 = vld [vmem:[#allocation10 + $0x10] sm:$0xff]  ;;  %v759_v22 = vld [vmem:[#allocation10 + $0x18] sm:$0xff]  ;;  %v774_v27 = vsel %vm133_vm0, 1.0, %v593_v26  ;;  %v152_v28 = vrot.slane %v728_v10, 7  ;;  %v150_v29 = vrot.slane %v709_v3, 7  ;;  %p538_p6 = scmp.lt.s32.totalorder %s536_s19, %s532_s18 }
  0x50   :  { %v766_v24 = vadd.f32 %v755_v19, %v753_v18  ;;  %v771_v25 = vadd.f32 %v759_v22, %v757_v21  ;;  %v151_v33 = vrot.slane %v719_v7, 7  ;;  %v153_v34 = vrot.slane %v733_v11, 7 }
  0x51   :  { %v157_v30 = vsel %vm154_vm1, %v152_v28, %v150_v29  ;;  %v155_v32 = vsel %vm154_vm1, %v150_v29, %v152_v28  ;;  %vm187_vm2 = vcmp.lt.s32.totalorder %v761_v23, 7  ;;  %v212_v42 = vrot.slane %v746_v16, 7  ;;  %p539_p7 = por %p538_p6, %p537_p5 }
  0x52   :  { %169 = vrot.lane.b32.xlu0 %v728_v10, %s592_s3  ;;  %173 = vrot.lane.b32.xlu1 %v733_v11, %s592_s3  ;;  %v159_v31 = vsub.f32 %v709_v3, %v157_v30  ;;  %v789_v35 = vsub.f32 %v728_v10, %v155_v32  ;;  %v158_v37 = vsel %vm154_vm1, %v153_v34, %v151_v33  ;;  %v214_v43 = vrot.slane %v751_v17, 7 }
  0x53   :  { %v161_v40 = vsub.f32 %v719_v7, %v158_v37  ;;  %v156_v41 = vsel %vm154_vm1, %v151_v33, %v153_v34  ;;  %vm139_vm3 = vcmp.gt.s32.totalorder %v132_v49, 0  ;;  %v215_v34 = vrot.slane %v771_v25, 7  ;;  %p540_p8 = pnand %p539_p7, %p533_p4 }
  0x54   :  { %v792_v36 = vmul.f32 %v774_v27, %v159_v31  ;;  %v185_v39 = vrot.slane %v789_v35, 1  ;;  %v809_v45 = vsub.f32 %v733_v11, %v156_v41  ;;  %v218_v48 = vsel %vm154_vm1, %v214_v43, %v212_v42 }
  0x55   :  { %v812_v46 = vmul.f32 %v774_v27, %v161_v40  ;;  %v220_v52 = vsub.f32 %v746_v16, %v218_v48  ;;  %v216_v53 = vsel %vm154_vm1, %v212_v42, %v214_v43  ;;  %v424_v20 = vsel %vm139_vm3, 1.0, %v593_v26 }
  0x56   :  { %228 = vrot.lane.b32.xlu0 %v746_v16, %s592_s3  ;;  %230 = vrot.lane.b32.xlu1 %v751_v17, %s592_s3  ;;  %v183_v38 = vrot.slane %v792_v36, 1  ;;  %v186_v51 = vrot.slane %v809_v45, 1  ;;  %v832_v56 = vsub.f32 %v751_v17, %v216_v53  ;;  %v213_v31 = vrot.slane %v766_v24, 7 }
  0x57   :  { %v184_v50 = vrot.slane %v812_v46, 1  ;;  %v835_v57 = vmul.f32 %v774_v27, %v220_v52 }
  0x58   :  { %v806_v44 = vsel %vm187_vm2, %v183_v38, %v185_v39  ;;  %v825_v54 = vsel %vm187_vm2, %v185_v39, %v183_v38  ;;  %v246_v61 = vrot.slane %v832_v56, 1  ;;  %v217_v39 = vsel %vm154_vm1, %v213_v31, %v215_v34 }
  0x59   :  { %v192_v47 = vsub.f32 %v792_v36, %v806_v44  ;;  %v829_v55 = vsel %vm187_vm2, %v184_v50, %v186_v51  ;;  %v193_v58 = vsub.f32 %v789_v35, %v825_v54  ;;  %v244_v60 = vrot.slane %v835_v57, 1 }
  0x5a   :  { %232 = vrot.lane.b32.xlu0 %v766_v24, %s592_s3  ;;  %234 = vrot.lane.b32.xlu1 %v771_v25, %s592_s3  ;;  %v194_v59 = vsub.f32 %v812_v46, %v829_v55  ;;  %v845_v62 = vsel %vm187_vm2, %v186_v51, %v184_v50  ;;  %v219_v42 = vsel %vm154_vm1, %v215_v34, %v213_v31  ;;  %v307_v54 = vmul.f32 0.105, %v733_v11 }
  0x5b   :  { %v849_v63 = vsel %vm187_vm2, %v244_v60, %v246_v61  ;;  %v195_v29 = vsub.f32 %v809_v45, %v845_v62  ;;  %v861_v26 = vsel %vm187_vm2, %v246_v61, %v244_v60  ;;  %v870_v43 = vsub.f32 %v771_v25, %v217_v39 }
  0x5c   :  { %v252_v30 = vsub.f32 %v835_v57, %v849_v63  ;;  %v222_v51 = vsub.f32 %v766_v24, %v219_v42  ;;  %v425_v46 = vadd.f32 -1.0, %v746_v16  ;;  %v426_v45 = vadd.f32 -1.0, %v751_v17 }
  0x5d   :  { %v247_v61 = vrot.slane %v870_v43, 1  ;;  %v1020_v63 = vsub.f32 %v832_v56, %v861_v26 }
  0x5e   :  { %v879_v60 = vmul.f32 %v774_v27, %v222_v51  ;;  %v328_v62 = vmul.f32 0.04, %v425_v46 }
  0x60   :  { %v245_v34 = vrot.slane %v879_v60, 1 }
  0x62   :  { %v894_v27 = vsel %vm187_vm2, %v245_v34, %v247_v61 }
  0xc0   :  { %v168_v28 = vpop.permute.xlu0 %167  ;;  %v172_v33 = vpop.permute.xlu1 %171 }
  0xc1   :  { %v175_v32 = vsub.f32 %v709_v3, %v168_v28  ;;  %v177_v37 = vsub.f32 %v719_v7, %v172_v33 }
  0xc3   :  { %v179_v38 = vmul.f32 %v424_v20, %v175_v32  ;;  %v872_v48 = vmul.f32 %v424_v20, %v177_v37 }
  0xc4   :  { %v170_v40 = vpop.permute.xlu0 %169  ;;  %v174_v50 = vpop.permute.xlu1 %173 }
  0xc5   :  { %v176_v49 = vsub.f32 %v728_v10, %v170_v40  ;;  %196 = vrot.lane.b32.xlu0 %v179_v38, %s594_s30  ;;  %v178_v52 = vsub.f32 %v733_v11, %v174_v50  ;;  %v898_v40 = vsel %vm187_vm2, %v247_v61, %v245_v34  ;;  %v281_v34 = vmul.f32 2.0, %v715_v6 }
  0xc6   :  { %v274_v6 = vmul.f32 %v705_v2, %v705_v2  ;;  %v427_v11 = vadd.f32 -1.0, %v766_v24 }
  0xc7   :  { %v180_v53 = vmul.f32 %v424_v20, %v176_v49  ;;  %v882_v31 = vmul.f32 %v424_v20, %v178_v52  ;;  %v273_v49 = vmul.f32 %v713_v5, %v713_v5 }
  0xc8   :  { %v229_v28 = vpop.permute.xlu0 %228  ;;  %v231_v33 = vpop.permute.xlu1 %230 }
  0xc9   :  { %v236_v32 = vsub.f32 %v746_v16, %v229_v28  ;;  %200 = vrot.lane.b32.xlu0 %v872_v48, %s594_s30  ;;  %198 = vrot.lane.b32.xlu1 %v180_v53, %s594_s30  ;;  %v237_v37 = vsub.f32 %v751_v17, %v231_v33  ;;  %v280_v33 = vmul.f32 2.0, %v703_v1  ;;  %v277_v1 = vmul.f32 %v739_v14, %v713_v5 }
  0xcb   :  { %v890_v39 = vmul.f32 %v424_v20, %v236_v32  ;;  %v904_v51 = vmul.f32 %v424_v20, %v237_v37  ;;  %v282_v37 = vmul.f32 2.0, %v711_v4  ;;  %v285_v4 = vadd.f32 %v281_v34, %v713_v5 }
  0xcc   :  { %v233_v42 = vpop.permute.xlu0 %232  ;;  %v235_v23 = vpop.permute.xlu1 %234  ;;  %v275_v5 = vmul.f32 %v721_v8, %v721_v8  ;;  %v279_v34 = vmul.f32 %v757_v21, %v721_v8  ;;  %v306_v21 = vmul.f32 0.105, %v719_v7 }
  0xcd   :  { %v238_v52 = vsub.f32 %v766_v24, %v233_v42  ;;  %202 = vrot.lane.b32.xlu1 %v882_v31, %s594_s30  ;;  %256 = vrot.lane.b32.xlu0 %v890_v39, %s594_s30  ;;  %v239_v61 = vsub.f32 %v771_v25, %v235_v23  ;;  %v276_v42 = vmul.f32 %v735_v12, %v701_v0 }
  0xce   :  { %v272_v23 = vmul.f32 %v701_v0, %v701_v0  ;;  %v278_v12 = vmul.f32 %v753_v18, %v705_v2  ;;  %v289_v44 = vmul.f32 %v285_v4, %v277_v1  ;;  %v1021_v24 = vsub.f32 %v879_v60, %v894_v27 }
  0xcf   :  { %v912_v28 = vmul.f32 %v424_v20, %v238_v52  ;;  %v914_v32 = vmul.f32 %v424_v20, %v239_v61  ;;  %v284_v20 = vadd.f32 %v280_v33, %v701_v0  ;;  %v283_v61 = vmul.f32 2.0, %v723_v9 }
  0xd0   :  { %v286_v33 = vadd.f32 %v282_v37, %v705_v2  ;;  %v304_v9 = vmul.f32 0.105, %v709_v3  ;;  %v292_v14 = vmul.f32 %v272_v23, %v737_v13  ;;  %v293_v3 = vmul.f32 %v273_v49, %v741_v15 }
  0xd1   :  { %258 = vrot.lane.b32.xlu1 %v904_v51, %s594_s30  ;;  %260 = vrot.lane.b32.xlu0 %v912_v28, %s594_s30  ;;  %v287_v18 = vadd.f32 %v283_v61, %v721_v8  ;;  %v305_v13 = vmul.f32 0.105, %v728_v10  ;;  %v295_v49 = vmul.f32 %v275_v5, %v759_v22  ;;  %v330_v5 = vmul.f32 0.04, %v427_v11 }
  0xd2   :  { %v297_v7 = vadd.f32 %v293_v3, %v289_v44  ;;  %v329_v44 = vmul.f32 0.04, %v426_v45  ;;  %v1022_v60 = vsub.f32 %v870_v43, %v898_v40 }
  0xd3   :  { %v291_v15 = vmul.f32 %v287_v18, %v279_v34 }
  0xd5   :  { %262 = vrot.lane.b32.xlu1 %v914_v32, %s594_s30  ;;  %v299_v4 = vadd.f32 %v295_v49, %v291_v15 }
 0x137   :  { %v197_v52 = vpop.permute.xlu0 %196 }
 0x138   :  { %v204_v50 = vsub.f32 %v179_v38, %v197_v52  ;;  %v288_v38 = vmul.f32 %v284_v20, %v276_v42 }
 0x13a   :  { %v208_v0 = vadd.f32 %v204_v50, %v192_v47  ;;  %v290_v47 = vmul.f32 %v286_v33, %v278_v12  ;;  %v294_v50 = vmul.f32 %v274_v6, %v755_v19 }
 0x13b   :  { %v199_v52 = vpop.permute.xlu1 %198  ;;  %v201_v41 = vpop.permute.xlu0 %200 }
 0x13c   :  { %v300_v2 = vmul.f32 0.961, %v208_v0  ;;  %v205_v37 = vsub.f32 %v180_v53, %v199_v52  ;;  %v206_v36 = vsub.f32 %v872_v48, %v201_v41  ;;  %v296_v48 = vadd.f32 %v292_v14, %v288_v38 }
 0x13e   :  { %v209_v42 = vadd.f32 %v205_v37, %v193_v58  ;;  %v210_v8 = vadd.f32 %v206_v36, %v194_v59  ;;  %v308_v53 = vadd.f32 %v304_v9, %v300_v2  ;;  %v298_v58 = vadd.f32 %v294_v50, %v290_v47 }
 0x13f   :  { %v203_v41 = vpop.permute.xlu1 %202  ;;  %v257_v20 = vpop.permute.xlu0 %256 }
 0x140   :  { %v301_v19 = vmul.f32 0.961, %v209_v42  ;;  %v302_v23 = vmul.f32 0.961, %v210_v8  ;;  %v207_v10 = vsub.f32 %v882_v31, %v203_v41  ;;  %v264_v35 = vsub.f32 %v890_v39, %v257_v20 }
 0x141   :  { %v312_v39 = vsub.f32 %v308_v53, %v296_v48 }
 0x142   :  { %v309_v55 = vadd.f32 %v305_v13, %v301_v19  ;;  %v310_v59 = vadd.f32 %v306_v21, %v302_v23  ;;  %v211_v61 = vadd.f32 %v207_v10, %v195_v29  ;;  %v268_v22 = vadd.f32 %v264_v35, %v252_v30 }
 0x143   :  { %v259_v1 = vpop.permute.xlu1 %258  ;;  %v261_v31 = vpop.permute.xlu0 %260  ;;  %v338_v14 = vmul.f32 %v312_v39, %v312_v39 }
 0x144   :  { %v303_v6 = vmul.f32 0.961, %v211_v61  ;;  %v316_v12 = vmul.f32 1.922, %v268_v22  ;;  %v265_v16 = vsub.f32 %v904_v51, %v259_v1  ;;  %v266_v33 = vsub.f32 %v912_v28, %v261_v31 }
 0x145   :  { %v313_v0 = vsub.f32 %v309_v55, %v297_v7  ;;  %v314_v9 = vsub.f32 %v310_v59, %v298_v58  ;;  %v428_v28 = vadd.f32 -1.0, %v771_v25 }
 0x146   :  { %v311_v29 = vadd.f32 %v307_v54, %v303_v6  ;;  %v320_v57 = vadd.f32 %v316_v12, %v296_v48  ;;  %v269_v30 = vadd.f32 %v265_v16, %v1020_v63  ;;  %v270_v38 = vadd.f32 %v266_v33, %v1021_v24 }
 0x147   :  { %v263_v52 = vpop.permute.xlu1 %262  ;;  %v340_v51 = vmul.f32 %v314_v9, %v314_v9  ;;  %v339_v37 = vmul.f32 %v313_v0, %v313_v0  ;;  %v331_v25 = vmul.f32 0.04, %v428_v28 }
 0x148   :  { %v317_v34 = vmul.f32 1.922, %v269_v30  ;;  %v318_v18 = vmul.f32 1.922, %v270_v38  ;;  %v267_v17 = vsub.f32 %v914_v32, %v263_v52  ;;  %v315_v2 = vsub.f32 %v311_v29, %v299_v4 }
 0x149   :  { %v342_v36 = vadd.f32 %v340_v51, %v338_v14  ;;  %v332_v56 = vadd.f32 %v328_v62, %v320_v57 }
 0x14a   :  { %v321_v26 = vadd.f32 %v317_v34, %v297_v7  ;;  %v322_v3 = vadd.f32 %v318_v18, %v298_v58  ;;  %v271_v27 = vadd.f32 %v267_v17, %v1022_v60  ;;  %v341_v47 = vmul.f32 %v315_v2, %v315_v2 }
 0x14b   :  { %v350_v21 = vmul.f32 %v332_v56, %v332_v56 }
 0x14c   :  { %v319_v50 = vmul.f32 1.922, %v271_v27  ;;  %v343_v13 = vadd.f32 %v341_v47, %v339_v37  ;;  %v334_v42 = vadd.f32 %v330_v5, %v322_v3  ;;  %v333_v32 = vadd.f32 %v329_v44, %v321_v26 }
 0x14e   :  { %v323_v8 = vadd.f32 %v319_v50, %v299_v4  ;;  %v365_v53 = vadd.f32 %v343_v13, %v342_v36  ;;  %v352_v41 = vmul.f32 %v334_v42, %v334_v42  ;;  %v351_v15 = vmul.f32 %v333_v32, %v333_v32 }
 0x150   :  { %366 = vadd.xlane.f32.xlu0 %v365_v53  ;;  %v335_v48 = vadd.f32 %v331_v25, %v323_v8  ;;  %v354_v20 = vadd.f32 %v352_v41, %v350_v21 }
 0x152   :  { %v353_v49 = vmul.f32 %v335_v48, %v335_v48 }
 0x154   :  { %v355_v19 = vadd.f32 %v353_v49, %v351_v15 }
 0x156   :  { %v380_v23 = vadd.f32 %v355_v19, %v354_v20 }
 0x158   :  { %381 = vadd.xlane.f32.xlu1 %v380_v23 }
 0x1dd   :  { %v367_v43 = vpop.xlane.xlu0 %366 }
 0x1de   :  { %v368_v40 = vrot.slane %v367_v43, 4 }
 0x1e0   :  { %v369_v10 = vadd.f32 %v368_v40, %v367_v43 }
 0x1e2   :  { %v370_v35 = vrot.slane %v369_v10, 2 }
 0x1e4   :  { %v371_v54 = vadd.f32 %v370_v35, %v369_v10 }
 0x1e5   :  { %v382_v7 = vpop.xlane.xlu1 %381 }
 0x1e6   :  { %v383_v58 = vrot.slane %v382_v7, 4  ;;  %v372_v46 = vrot.slane %v371_v54, 1 }
 0x1e8   :  { %v384_v55 = vadd.f32 %v383_v58, %v382_v7  ;;  %v373_v59 = vadd.f32 %v372_v46, %v371_v54 }
 0x1ea   :  { %v385_v61 = vrot.slane %v384_v55, 2  ;;  %429 = vpush %v373_v59 }
 0x1ec   :  { %v386_v22 = vadd.f32 %v385_v61, %v384_v55 }
 0x1ee   :  { %v387_v1 = vrot.slane %v386_v22, 1 }
 0x1f0   :  { %v388_v31 = vadd.f32 %v387_v1, %v386_v22 }
 0x1f2   :  { %431 = vpush %v388_v31 }
 0x21b   :  { %s430_s17 = spop %429 }
 0x21c   :  { %v375_v4 = vstv %s430_s17 }
 0x21d   :  { %377 = vst.msk [vmem:[#allocation12] sm:$0x1] %vm376_vm4, %v375_v4 }
 0x21e   :  { %543 = shalt.err (!%p540_p8)
}
 0x21f   :  { %s544_s23 = scalar_lea.hbm %s1018_s4, 16 }
 0x220   :  { %p545_p9 = scmp.ne.s32.totalorder %s1018_s4, %s544_s23  ;;  %p548_p10 = scmp.lt.u32.totalorder %s544_s23, %s1018_s4 }
 0x222   :  { %p550_p11 = pnand %p548_p10, %p545_p9 }
 0x224   :  { %553 = shalt.err (!%p550_p11)
}
 0x225   :  { %401 = dma.vmem_to_hbm [thread:$0]  %s399_s1, 16, %s1018_s4, [#allocation6]  }
 0x226   :  { %s596_s0 = smov [#allocation13]   ;;  %s432_s7 = spop %431 }
 0x227   :  { %s408_s21 = sshll.u32 %s596_s0, 4  ;;  %v390_v39 = vstv %s432_s7  ;;  %s409_s21 = int_to_ptr.vmem [resolvable:$true] %s408_s21 }
 0x228   :  { %391 = vst.msk [vmem:[#allocation13] sm:$0x1] %vm376_vm4, %v390_v39  ;;  %s554_s8 = scalar_lea.vmem %s409_s21, 16  ;;  %s558_s9 = scalar_lea.vmem %s409_s21, 32 }
 0x229   :  { %p555_p12 = scmp.ne.s32.totalorder %s409_s21, %s554_s8  ;;  %p559_p13 = scmp.lt.s32.totalorder %s409_s21, %s409_s21 }
 0x22a   :  { %p560_p0 = scmp.lt.s32.totalorder %s558_s9, %s554_s8 }
 0x22c   :  { %p561_p1 = por %p560_p0, %p559_p13 }
 0x22e   :  { %p562_p2 = pnand %p561_p1, %p555_p12 }
 0x230   :  { %565 = shalt.err (!%p562_p2)
}
 0x231   :  { %s566_s12 = scalar_lea.hbm %s1019_s5, 16 }
 0x232   :  { %p567_p3 = scmp.ne.s32.totalorder %s1019_s5, %s566_s12  ;;  %p570_p4 = scmp.lt.u32.totalorder %s566_s12, %s1019_s5 }
 0x234   :  { %p572_p5 = pnand %p570_p4, %p567_p3 }
 0x236   :  { %575 = shalt.err (!%p572_p5)
}
 0x237   :  { %411 = dma.vmem_to_hbm [thread:$0]  %s409_s21, 16, %s1019_s5, [#allocation14]  }
 0x238   :  { %582 = dma.done.wait [#allocation6], 16  }
 0x239   :  { %583 = vsyncadd [#allocation6], 4294967280 }
 0x23a   :  { %584 = dma.done.wait [#allocation14], 16  }
 0x23b   :  { %585 = vsyncadd [#allocation14], 4294967280 }
 0x23c   :  { %418 = vsyncpa [#allocation5], 1 }
 0x23d   :  { %419 = vsyncpa [#allocation8], 1 }
 0x23e   :  { %420 = vsyncpa [#allocation11], 1 }
 0x23f   :  { %421 = vsyncpa [#allocation6], 1 }
 0x240   :  { %422 = vsyncpa [#allocation14], 1 }

</bundles_post_ra>
